<compile_context>
chip_gen: v7x
topology: tpu7x:2x2x1
jax: 0.10.0
libtpu: 0.0.40
codegen_flags: <defaults>
</compile_context>

<pallas_src>
import functools

import jax
import jax.numpy as jnp
from jax.experimental import pallas as pl
from jax.experimental.pallas import tpu as pltpu

NEG_SLOPE = 0.01      # torch.nn.functional.leaky_relu default
LANE = 128
SUBLANE = 16          # round batch tiles to 16 (safe for bf16 output tiles)


def _round_up(n, m):
    return ((n + m - 1) // m) * m


def wolpertinger_mlp_kernel(x_ref, w_ref, b_ref, out_ref, h_ref):
    """Fused MLP over one batch tile.

    x_ref  : (TB, in_dim)  f32   unpadded input activations
    w_ref  : (L, D, D)     f32   zero-padded weights, VMEM-resident
    b_ref  : (L, 1, D)     f32   zero-padded biases,  VMEM-resident
    out_ref: (TB, D)             lane-dense output slab (out dtype)
    h_ref  : (TB, D)       f32   scratch: lane-padded activation staging
    """
    n_layers = w_ref.shape[0]
    in_dim = x_ref.shape[1]

    # Build the 128-lane activation in VMEM: zero-fill then masked store of x.
    # Lanes in_dim..D-1 are exactly zero, so the zero-padded weight rows
    # contribute nothing and zeros propagate through every layer's pad lanes.
    h_ref[...] = jnp.zeros_like(h_ref)
    h_ref[:, :in_dim] = x_ref[...].astype(h_ref.dtype)
    h = h_ref[...]

    for i in range(n_layers):                       # static unroll (L == 3)
        z = jnp.dot(h, w_ref[i], preferred_element_type=jnp.float32)  # MXU
        z = z + b_ref[i]                            # (1, D) broadcast add
        h = jnp.maximum(z, NEG_SLOPE * z)           # leaky_relu: vmul + vmax

    out_ref[...] = h.astype(out_ref.dtype)


def pack_wolpertinger_params(params, input_dim, dtype=jnp.float32):
    """Pad & stack all (W, b) pairs ONCE into (L, D, D) weights + (L, 1, D) biases.

    Weights are kept f32 by default: they are DMA'd a single time (constant
    index_map) so narrowing them saves almost no bandwidth but would force
    per-layer casts and looser parity.
    """
    dims = [input_dim] + [int(w.shape[1]) for w, _ in params]
    d_pad = _round_up(max(dims), LANE)
    n_layers = len(params)
    w_stack = jnp.zeros((n_layers, d_pad, d_pad), jnp.float32)
    b_stack = jnp.zeros((n_layers, 1, d_pad), jnp.float32)
    for i, (w, b) in enumerate(params):
        din, dout = w.shape
        w_stack = w_stack.at[i, :din, :dout].set(w.astype(jnp.float32))
        b_stack = b_stack.at[i, 0, :dout].set(b.astype(jnp.float32))
    return w_stack.astype(dtype), b_stack.astype(dtype)


def _pick_batch_tile(batch, batch_tile):
    """Tile so the grid has >= 2 steps when possible (v7x megacore sharding)."""
    half = _round_up(max(pl.cdiv(batch, 2), 1), SUBLANE)
    return max(SUBLANE, min(batch_tile, half))


@functools.partial(
    jax.jit,
    static_argnames=("out_dim", "out_dtype", "batch_tile", "return_padded"),
)
def wolpertinger_forward(x, w_stack, b_stack, *, out_dim=50,
                         out_dtype=jnp.bfloat16, batch_tile=2048,
                         return_padded=False):
    """x: (B, input_dim) float32.  Packed params from pack_wolpertinger_params."""
    batch, in_dim = x.shape
    n_layers, d_pad, _ = w_stack.shape

    tb = _pick_batch_tile(batch, batch_tile)
    grid = (pl.cdiv(batch, tb),)     # boundary block: OOB reads ignored,
                                     # OOB writes masked by Pallas.

    out = pl.pallas_call(
        wolpertinger_mlp_kernel,
        out_shape=jax.ShapeDtypeStruct((batch, d_pad), out_dtype),
        grid=grid,
        in_specs=[
            # Unpadded x streamed per batch tile (50 lanes == full array dim).
            pl.BlockSpec((tb, in_dim), lambda i: (i, 0)),
            # Constant index_maps: params DMA'd once, resident across the grid.
            pl.BlockSpec((n_layers, d_pad, d_pad), lambda i: (0, 0, 0)),
            pl.BlockSpec((n_layers, 1, d_pad), lambda i: (0, 0, 0)),
        ],
        out_specs=pl.BlockSpec((tb, d_pad), lambda i: (i, 0)),
        scratch_shapes=[pltpu.VMEM((tb, d_pad), jnp.float32)],
        compiler_params=pltpu.CompilerParams(
            dimension_semantics=("parallel",),   # v7x: shard batch over 2 TCs
        ),
    )(x, w_stack, b_stack)

    if return_padded:
        return out                  # (B, 128) lane-dense slab, zero slicing cost
    return out[:, :out_dim]         # slice stays inside this jit


def init_params(key, nn_dim, input_dim=50, final_dim=50):
    """Synthetic init mirroring nn.Linear's U(-1/sqrt(fan_in), 1/sqrt(fan_in))."""
    dims = []
    for i, dim in enumerate(nn_dim):
        if i == 0:
            dims.append((input_dim, dim))
        elif i == len(nn_dim) - 1:
            dims.append((dim, final_dim))
        else:
            dims.append((dim, dim))
    params = []
    for fan_in, fan_out in dims:
        key, kw, kb = jax.random.split(key, 3)
        bound = 1.0 / jnp.sqrt(jnp.float32(fan_in))
        w = jax.random.uniform(kw, (fan_in, fan_out), jnp.float32, -bound, bound)
        b = jax.random.uniform(kb, (fan_out,), jnp.float32, -bound, bound)
        params.append((w, b))
    return params


def reference_forward(x, params):
    """Pure-JAX f32 reference of the PyTorch forward."""
    h = x
    for w, b in params:
        z = h @ w + b
        h = jnp.where(z > 0, z, NEG_SLOPE * z)
    return h


if __name__ == "__main__":
    key = jax.random.PRNGKey(0)
    key, kx, kxb, kp = jax.random.split(key, 4)

    nn_dim = [32, 32, 32]      # hidden dims (all equal -> valid chaining)
    k = 4                      # Wolpertinger k; unused by forward()
    input_dim = 50
    final_dim = 50

    params = init_params(kp, nn_dim, input_dim=input_dim, final_dim=final_dim)
    w_stack, b_stack = pack_wolpertinger_params(params, input_dim, jnp.float32)

    # --- small batch, f32 output store: tight parity vs pure-JAX reference ---
    batch = 32                 # tb=16 -> grid=(2,), evenly divided
    x = jax.random.normal(kx, (batch, input_dim), jnp.float32)
    ref = reference_forward(x, params)
    out = jax.block_until_ready(
        wolpertinger_forward(x, w_stack, b_stack,
                             out_dim=final_dim, out_dtype=jnp.float32))
    assert out.shape == (batch, final_dim), out.shape
    assert jnp.allclose(out, ref, atol=1e-4, rtol=1e-4), "f32 mismatch vs reference"

    # --- bigger batch, bf16 output store (HBM-byte win), masked boundary block
    big_batch = 600            # tb=304 -> grid=(2,), second block partially OOB
    xb = jax.random.normal(kxb, (big_batch, input_dim), jnp.float32)
    refb = reference_forward(xb, params)
    outb = jax.block_until_ready(
        wolpertinger_forward(xb, w_stack, b_stack,
                             out_dim=final_dim, out_dtype=jnp.bfloat16))
    assert outb.shape == (big_batch, final_dim), outb.shape
    assert jnp.allclose(outb.astype(jnp.float32), refb, atol=3e-2, rtol=3e-2), \
        "bf16-store mismatch vs reference"

    print("KERNEL_OK")
</pallas_src>

<mosaic_0001>
module attributes {stable_mosaic.version = 11 : i64} {
  func.func @wolpertinger_mlp_kernel(%arg0: i32, %arg1: memref<16x50xf32, #tpu.memory_space<vmem>>, %arg2: memref<3x128x128xf32, #tpu.memory_space<vmem>>, %arg3: memref<3x1x128xf32, #tpu.memory_space<vmem>>, %arg4: memref<16x128xf32, #tpu.memory_space<vmem>>, %arg5: memref<16x128xf32, #tpu.memory_space<vmem>>) attributes {dimension_semantics = [#tpu.dimension_semantics<parallel>], iteration_bounds = array<i64: 2>, scalar_prefetch = 0 : i64, scratch_operands = 1 : i64, tpu.core_type = #tpu.core_type<tc>, window_params = [{transform_indices = @transform_0, window_bounds = array<i64: 16, 50>}, {pipeline_mode = #tpu.pipeline_mode<synchronous>, transform_indices = @transform_1, window_bounds = array<i64: 3, 128, 128>}, {pipeline_mode = #tpu.pipeline_mode<synchronous>, transform_indices = @transform_2, window_bounds = array<i64: 3, 1, 128>}, {transform_indices = @transform_3, window_bounds = array<i64: 16, 128>}]} {
    %cst = arith.constant 0.000000e+00 : f32
    %0 = vector.broadcast %cst : f32 to vector<16x128xf32>
    %c0 = arith.constant 0 : index
    %c0_0 = arith.constant 0 : index
    %1 = vector.load %arg5[%c0, %c0_0] : memref<16x128xf32, #tpu.memory_space<vmem>>, vector<16x128xf32>
    tpu.vector_store %arg5[%c0, %c0_0], %0 {strides = array<i32>} : memref<16x128xf32, #tpu.memory_space<vmem>>, vector<16x128xf32>,
    %c0_1 = arith.constant 0 : index
    %c0_2 = arith.constant 0 : index
    %2 = vector.load %arg1[%c0_1, %c0_2] : memref<16x50xf32, #tpu.memory_space<vmem>>, vector<16x50xf32>
    %c0_3 = arith.constant 0 : index
    %c0_4 = arith.constant 0 : index
    %3 = vector.load %arg5[%c0_3, %c0_4] : memref<16x128xf32, #tpu.memory_space<vmem>>, vector<16x50xf32>
    tpu.vector_store %arg5[%c0_3, %c0_4], %2 {strides = array<i32>} : memref<16x128xf32, #tpu.memory_space<vmem>>, vector<16x50xf32>,
    %c0_5 = arith.constant 0 : index
    %c0_6 = arith.constant 0 : index
    %4 = vector.load %arg5[%c0_5, %c0_6] : memref<16x128xf32, #tpu.memory_space<vmem>>, vector<16x128xf32>
    %c0_7 = arith.constant 0 : index
    %c0_8 = arith.constant 0 : index
    %c0_9 = arith.constant 0 : index
    %5 = vector.load %arg2[%c0_7, %c0_8, %c0_9] : memref<3x128x128xf32, #tpu.memory_space<vmem>>, vector<1x128x128xf32>
    %6 = vector.shape_cast %5 : vector<1x128x128xf32> to vector<128x128xf32>
    %cst_10 = arith.constant dense<0.000000e+00> : vector<16x128xf32>
    %7 = tpu.matmul %4, %6, %cst_10 {dimension_numbers = #tpu.dot_dimension_numbers<[1], [0], [0], [1], [0, 0, 1, 1], [], []>} : vector<16x128xf32>, vector<128x128xf32>, vector<16x128xf32> -> vector<16x128xf32>
    %c0_11 = arith.constant 0 : index
    %c0_12 = arith.constant 0 : index
    %c0_13 = arith.constant 0 : index
    %8 = vector.load %arg3[%c0_11, %c0_12, %c0_13] : memref<3x1x128xf32, #tpu.memory_space<vmem>>, vector<1x1x128xf32>
    %9 = vector.shape_cast %8 : vector<1x1x128xf32> to vector<1x128xf32>
    %10 = vector.broadcast %9 : vector<1x128xf32> to vector<16x128xf32>
    %11 = arith.addf %7, %10 : vector<16x128xf32>
    %cst_14 = arith.constant 0.00999999977 : f32
    %12 = vector.broadcast %cst_14 : f32 to vector<16x128xf32>
    %13 = arith.mulf %12, %11 : vector<16x128xf32>
    %14 = arith.maximumf %11, %13 : vector<16x128xf32>
    %c1 = arith.constant 1 : index
    %c0_15 = arith.constant 0 : index
    %c0_16 = arith.constant 0 : index
    %15 = vector.load %arg2[%c1, %c0_15, %c0_16] : memref<3x128x128xf32, #tpu.memory_space<vmem>>, vector<1x128x128xf32>
    %16 = vector.shape_cast %15 : vector<1x128x128xf32> to vector<128x128xf32>
    %cst_17 = arith.constant dense<0.000000e+00> : vector<16x128xf32>
    %17 = tpu.matmul %14, %16, %cst_17 {dimension_numbers = #tpu.dot_dimension_numbers<[1], [0], [0], [1], [0, 0, 1, 1], [], []>} : vector<16x128xf32>, vector<128x128xf32>, vector<16x128xf32> -> vector<16x128xf32>
    %c1_18 = arith.constant 1 : index
    %c0_19 = arith.constant 0 : index
    %c0_20 = arith.constant 0 : index
    %18 = vector.load %arg3[%c1_18, %c0_19, %c0_20] : memref<3x1x128xf32, #tpu.memory_space<vmem>>, vector<1x1x128xf32>
    %19 = vector.shape_cast %18 : vector<1x1x128xf32> to vector<1x128xf32>
    %20 = vector.broadcast %19 : vector<1x128xf32> to vector<16x128xf32>
    %21 = arith.addf %17, %20 : vector<16x128xf32>
    %cst_21 = arith.constant 0.00999999977 : f32
    %22 = vector.broadcast %cst_21 : f32 to vector<16x128xf32>
    %23 = arith.mulf %22, %21 : vector<16x128xf32>
    %24 = arith.maximumf %21, %23 : vector<16x128xf32>
    %c2 = arith.constant 2 : index
    %c0_22 = arith.constant 0 : index
    %c0_23 = arith.constant 0 : index
    %25 = vector.load %arg2[%c2, %c0_22, %c0_23] : memref<3x128x128xf32, #tpu.memory_space<vmem>>, vector<1x128x128xf32>
    %26 = vector.shape_cast %25 : vector<1x128x128xf32> to vector<128x128xf32>
    %cst_24 = arith.constant dense<0.000000e+00> : vector<16x128xf32>
    %27 = tpu.matmul %24, %26, %cst_24 {dimension_numbers = #tpu.dot_dimension_numbers<[1], [0], [0], [1], [0, 0, 1, 1], [], []>} : vector<16x128xf32>, vector<128x128xf32>, vector<16x128xf32> -> vector<16x128xf32>
    %c2_25 = arith.constant 2 : index
    %c0_26 = arith.constant 0 : index
    %c0_27 = arith.constant 0 : index
    %28 = vector.load %arg3[%c2_25, %c0_26, %c0_27] : memref<3x1x128xf32, #tpu.memory_space<vmem>>, vector<1x1x128xf32>
    %29 = vector.shape_cast %28 : vector<1x1x128xf32> to vector<1x128xf32>
    %30 = vector.broadcast %29 : vector<1x128xf32> to vector<16x128xf32>
    %31 = arith.addf %27, %30 : vector<16x128xf32>
    %cst_28 = arith.constant 0.00999999977 : f32
    %32 = vector.broadcast %cst_28 : f32 to vector<16x128xf32>
    %33 = arith.mulf %32, %31 : vector<16x128xf32>
    %34 = arith.maximumf %31, %33 : vector<16x128xf32>
    %c0_29 = arith.constant 0 : index
    %c0_30 = arith.constant 0 : index
    %35 = vector.load %arg4[%c0_29, %c0_30] : memref<16x128xf32, #tpu.memory_space<vmem>>, vector<16x128xf32>
    tpu.vector_store %arg4[%c0_29, %c0_30], %34 {strides = array<i32>} : memref<16x128xf32, #tpu.memory_space<vmem>>, vector<16x128xf32>,
    return
  }
  func.func @transform_0(%arg0: i32) -> (i32, i32) {
    %c0_i32 = arith.constant 0 : i32
    %c0_i32_0 = arith.constant 0 : i32
    return %arg0, %c0_i32 : i32, i32
  }
  func.func @transform_1(%arg0: i32) -> (i32, i32, i32) {
    %c0_i32 = arith.constant 0 : i32
    %c0_i32_0 = arith.constant 0 : i32
    %c0_i32_1 = arith.constant 0 : i32
    %c0_i32_2 = arith.constant 0 : i32
    return %c0_i32, %c0_i32_0, %c0_i32_1 : i32, i32, i32
  }
  func.func @transform_2(%arg0: i32) -> (i32, i32, i32) {
    %c0_i32 = arith.constant 0 : i32
    %c0_i32_0 = arith.constant 0 : i32
    %c0_i32_1 = arith.constant 0 : i32
    %c0_i32_2 = arith.constant 0 : i32
    return %c0_i32, %c0_i32_0, %c0_i32_1 : i32, i32, i32
  }
  func.func @transform_3(%arg0: i32) -> (i32, i32) {
    %c0_i32 = arith.constant 0 : i32
    %c0_i32_0 = arith.constant 0 : i32
    return %arg0, %c0_i32 : i32, i32
  }
}

</mosaic_0001>

<bundles_post_ra>
// kernel: wolpertinger_forward.1
= control target key start
LH: loop header
LB: loop body
LE: loop exit
PB: predicated region body
PF: predicated region fallthrough
CT: control target
= control target key end

     0   :  { %8 = vsyncpa [#allocation4], 0  ;;  %s1342_s0 = inlined_call_operand.hbm [shape: f32[32,50], index: 0, kind: input, shape index: {}]   ;;  %s1343_s1 = inlined_call_operand.hbm [shape: f32[3,128,128], index: 1, kind: input, shape index: {}]   ;;  %s1344_s2 = inlined_call_operand.vmem [shape: f32[3,1,128], index: 2, kind: input, shape index: {}]   ;;  %s1345_s3 = inlined_call_operand.hbm [shape: f32[32,128], index: 3, kind: output, shape index: {}]  }
   0x1   :  { %10 = vsyncpa [#allocation4 + $0x1], 0 }
   0x2   :  { %11 = vsyncpa [#allocation7], 0 }
   0x3   :  { %12 = vsyncpa [#allocation5], 0 }
   0x4   :  { %14 = vsyncpa [#allocation5 + $0x1], 0  ;;  %s1122_s12 = smov 0   ;;  %s1124_s13 = smov 0  }
   0x5   :  { %s1126_s14 = smov 0   ;;  %s1128_s15 = smov 0  }
   0x6 LB: > { %s1143_s16 = sadd.s32 4294967295, %s1092_s15   ;;  %s624_s17 = sadd.s32 4294967294, %s1092_s15   ;;  %s1092_s15 = sphi %s1128_s15, %s1365_s15   ;;  %s1088_s14 = sphi %s1126_s14, %s1364_s14   ;;  %s1084_s13 = sphi %s1124_s13, %s1363_s13   ;;  %s1080_s12 = sphi %s1122_s12, %s1362_s12  }
   0x7   : > { %p40_p0 = scmp.ne.s32.totalorder %s1084_s13, %s1080_s12  ;;  %p1346_p1 = scmp.eq.s32.totalorder %s1143_s16, 0 }
   0x8   : > { %p112_p3 = scmp.eq.s32.totalorder %s624_s17, 1  ;;  %p625_p5 = scmp.ge.s32.totalorder %s1092_s15, 1 }
   0x9   : > { %p1152_p4 = por %p1346_p1, %p40_p0  ;;  %p119_p7 = scmp.lt.s32.totalorder %s1092_s15, 3 }
   0xa   : > { %p1157_p6 = por %p112_p3, %p40_p0  ;;  %s1094_s21 = smov [#allocation6]  }
   0xb   : > { %s1349_s18 = scalar_select %p1152_p4, 1, 0 }
   0xc   : > { %s1350_s19 = scalar_select %p1157_p6, 1, 0 }
   0xd   : > { %p1162_p8 = pnand %p625_p5, %p119_p7  ;;  %s131_s22 = sshll.u32 %s1094_s21, 4  ;;  %s1166_s22 = int_to_ptr.vmem [resolvable:$true] %s131_s22 }
   0xe   : > { %s1178_s24 = sadd.s32 1, %s1092_s15   ;;  %s27_s25 = sadd.s32 1, %s1088_s14 }
   0xf   : > { %s1351_s20 = scalar_select %p1162_p8, 1, 0 }
  0x10   : > { %p910_p9 = pneg %p1162_p8  ;;  %s24_s26 = ssub.s32 %s1092_s15, %s1178_s24 }
  0x11   : > { %s964_s29 = scalar_lea.hbm %s1343_s1, 6144 }
  0x12   : > { %p1173_p11 = pnand %p910_p9, %p1346_p1  ;;  %p965_p12 = scmp.ne.s32.totalorder %s1343_s1, %s964_s29 }
  0x13   : > { %p971_p5 = scmp.lt.u32.totalorder %s964_s29, %s1343_s1 }
  0x14   : > { %p966_p13 = pneg %p1173_p11 }
  0x16   : > { %p967_p0 = pnand %p966_p13, %p965_p12 }
  0x18   : > { %p968_p3 = pneg %p967_p0 }
  0x1a   : > { %p973_p7 = pnand %p971_p5, %p968_p3 }
  0x1c   : > { %976 = shalt.err (!%p973_p7)
}
  0x1d   : > { %s977_s7 = scalar_lea.vmem %s1166_s22, 6144  ;;  %p985_p2 = scmp.lt.s32.totalorder %s1166_s22, %s1166_s22 }
  0x1e   : > { %p978_p9 = scmp.ne.s32.totalorder %s1166_s22, %s977_s7  ;;  %p986_p6 = scmp.lt.s32.totalorder %s977_s7, %s977_s7 }
  0x20   : > { %p980_p10 = pnand %p978_p9, %p966_p13  ;;  %p987_p4 = por %p986_p6, %p985_p2 }
  0x22   : > { %p981_p1 = pneg %p980_p10 }
  0x24   : > { %p988_p8 = pnand %p987_p4, %p981_p1 }
  0x26   : > { %991 = shalt.err (!%p988_p8)
}
  0x27   : > { %s1095_s8 = smov 128   ;;  %s1096_s9 = smov 8  }
  0x28   : > { %913 = dma.hbm_to_vmem [thread:$0]  (!%p1173_p11), %s1343_s1, 6144, %s1166_s22, [#allocation7], %s1095_s8, %s1095_s8, %s1096_s9  }
  0x29   : > { %p25_p1 = scmp.eq.s32.totalorder %s24_s26, 0  ;;  %p34_p2 = scmp.ne.s32.totalorder %s1088_s14, %s1084_s13 }
  0x2a   : > { %p35_p4 = scmp.eq.s32.totalorder %s1092_s15, 0  ;;  %p923_p6 = scmp.lt.s32.totalorder %s1092_s15, 2 }
  0x2b   : > { %s1212_s17 = scalar_select %p25_p1, %s1088_s14, %s27_s25  }
  0x2c   : > { %p36_p8 = por %p35_p4, %p34_p2  ;;  %p1353_p10 = scmp.eq.s32.totalorder %s1143_s16, 1 }
  0x2d   : > { %s148_s23 = sand.u32 1, %s1088_s14   ;;  %s645_s27 = sshll.u32 %s1092_s15, 8 }
  0x2e   : > { %p1216_p12 = por %p1353_p10, %p34_p2  ;;  %s628_s28 = sshll.u32 %s148_s23, 4 }
  0x2f   : > { %s1225_s4 = scalar_lea.hbm %s1342_s0, %s645_s27  ;;  %s152_s22 = scalar_lea.vmem [#allocation3], %s628_s28 }
  0x30   : > { %s159_s25 = sshll.u32 %s152_s22, 4  ;;  %p1227_p11 = pnand %p923_p6, %p36_p8  ;;  %s1231_s25 = int_to_ptr.vmem [resolvable:$true] %s159_s25 }
  0x31   : > { %s1233_s5 = scalar_lea.sflag [#allocation4], %s148_s23  ;;  %s992_s6 = scalar_lea.hbm %s1225_s4, 256 }
  0x32   : > { %p993_p13 = scmp.ne.s32.totalorder %s1225_s4, %s992_s6  ;;  %p994_p0 = pneg %p1227_p11 }
  0x33   : > { %s997_s11 = scalar_lea.hbm %s1342_s0, 512  ;;  %p998_p7 = scmp.lt.u32.totalorder %s1225_s4, %s1342_s0 }
  0x34   : > { %p995_p3 = pnand %p994_p0, %p993_p13  ;;  %p999_p9 = scmp.lt.u32.totalorder %s997_s11, %s992_s6 }
  0x35   : > { %p1001_p2 = scmp.lt.u32.totalorder %s992_s6, %s1225_s4 }
  0x36   : > { %p996_p5 = pneg %p995_p3  ;;  %p1000_p1 = por %p999_p9, %p998_p7 }
  0x38   : > { %p1002_p4 = por %p1001_p2, %p1000_p1 }
  0x3a   : > { %p1003_p6 = pnand %p1002_p4, %p996_p5 }
  0x3c   : > { %1006 = shalt.err (!%p1003_p6)
}
  0x3d   : > { %s1007_s23 = scalar_lea.vmem %s1231_s25, 256  ;;  %s1097_s29 = smov [#allocation3]  }
  0x3e   : > { %p1008_p8 = scmp.ne.s32.totalorder %s1231_s25, %s1007_s23  ;;  %s1012_s30 = sshll.u32 %s1097_s29, 4  ;;  %s1013_s30 = int_to_ptr.vmem [resolvable:$false] %s1012_s30 }
  0x3f   : > { %s1014_s22 = scalar_lea.vmem %s1013_s30, 512  ;;  %p1015_p3 = scmp.lt.s32.totalorder %s1231_s25, %s1013_s30 }
  0x40   : > { %p1010_p10 = pnand %p1008_p8, %p994_p0  ;;  %p1016_p7 = scmp.lt.s32.totalorder %s1014_s22, %s1007_s23 }
  0x42   : > { %p1011_p13 = pneg %p1010_p10  ;;  %p1017_p9 = por %p1016_p7, %p1015_p3 }
  0x44   : > { %p1018_p1 = pnand %p1017_p9, %p1011_p13 }
  0x46   : > { %1021 = shalt.err (!%p1018_p1)
}
  0x47   : > { %917 = dma.hbm_to_vmem [thread:$0]  (!%p1227_p11), %s1225_s4, 256, %s1231_s25, %s1233_s5, %s1095_s8, %s1095_s8, %s1096_s9  }
  0x48   : > { %p1356_p0 = scmp.ne.s32.totalorder %s1351_s20, 0 }
  0x49   : > { %s1267_s6 = sand.u32 (!%p1356_p0), 1, %s1084_s13   ;;  %p1357_p5 = scmp.ne.s32.totalorder (!%p1356_p0), %s1349_s18, 0 }
  0x4a   : > { %171 = sbr.rel (%p1356_p0) target bundleno = 794 (0x31a), region = 32  ;;  %s632_s7 = sshll.u32 (!%p1356_p0), %s1267_s6, 4 }
  0x4b   : > { %s174_s10 = scalar_lea.sflag (!%p1356_p0), [#allocation4], %s1267_s6  ;;  %s177_s26 = scalar_lea.vmem (!%p1356_p0), [#allocation3], %s632_s7 }
  0x51   : > { %1067 = dma.done.wait (%p1357_p5), %s174_s10, 256  }
  0x52   : > { %1069 = vsyncadd (%p1357_p5), %s174_s10, 4294967040  ;;  %p1358_p11 = scmp.eq.s32.totalorder %s1143_s16, 0 }
  0x54   : > { %1071 = dma.done.wait (%p1358_p11), [#allocation7], 6144   ;;  %p1359_p2 = pmov %p1358_p11 }
  0x55   : > { %v1098_v0 = vmov 0.0   ;;  %v215_v1 = vld [vmem:[#allocation6] sm:$0xff]  ;;  %v216_v2 = vld [vmem:[#allocation6 + $0x8] sm:$0xff]  ;;  %v217_v3 = vld [vmem:[#allocation6 + $0x10] sm:$0xff]  ;;  %vm210_vm0 = vcmask 408576   ;;  %s203_s5 = scalar_lea.vmem [#allocation8], %s632_s7 }
  0x56   : > { %1073 = vsyncadd (%p1359_p2), [#allocation7], 4294961152  ;;  %206 = vst [vmem:[#allocation2] sm:$0xff] %v1098_v0  ;;  %v806_v4 = vpack.c.bf16 %v216_v2, %v215_v1  ;;  %v218_v5 = vld [vmem:[#allocation6 + $0x18] sm:$0xff]  ;;  %v219_v7 = vld [vmem:[#allocation6 + $0x20] sm:$0xff]  ;;  %s541_s11 = sshll.u32 %s203_s5, 4  ;;  %s1293_s11 = int_to_ptr.vmem [resolvable:$true] %s541_s11 }
  0x57   : > { %207 = vst [vmem:[#allocation2 + $0x8] sm:$0xff] %v1098_v0  ;;  %v810_v6 = vpack.c.bf16 %v218_v5, %v217_v3  ;;  %v220_v8 = vld [vmem:[#allocation6 + $0x28] sm:$0xff]  ;;  %v221_v9 = vld [vmem:[#allocation6 + $0x30] sm:$0xff]  ;;  %v222_v11 = vld [vmem:[#allocation6 + $0x38] sm:$0xff]  ;;  %s646_s27 = sshll.u32 %s1143_s16, 8  ;;  %s528_s30 = scalar_lea.sflag [#allocation5], %s1267_s6 }
  0x58   : > { %807 = vmatprep.subr.bf16.mxu0 %v806_v4  ;;  %v814_v10 = vpack.c.bf16 %v220_v8, %v219_v7  ;;  %v208_v12 = vld [vmem:[%s177_s26] sm:$0xff]  ;;  %v209_v13 = vld [vmem:[%s177_s26 + $0x8] sm:$0xff]  ;;  %v818_v22 = vpack.c.bf16 %v222_v11, %v221_v9  ;;  %s1298_s29 = scalar_lea.hbm %s1345_s3, %s646_s27  ;;  %s1022_s22 = scalar_lea.vmem %s1293_s11, 256 }
  0x59   : > { %809 = vmatpush3.bf16.msra.mxu0 %v806_v4  ;;  %211 = vst.msk [vmem:[#allocation2] sm:$0xff] %vm210_vm0, %v208_v12  ;;  %212 = vst.msk [vmem:[#allocation2 + $0x8] sm:$0xff] %vm210_vm0, %v209_v13  ;;  %v318_v14 = vld [vmem:[#allocation6 + $0x80] sm:$0xff]  ;;  %v319_v15 = vld [vmem:[#allocation6 + $0x88] sm:$0xff]  ;;  %p1023_p4 = scmp.ne.s32.totalorder %s1293_s11, %s1022_s22  ;;  %s1099_s16 = smov [#allocation8]  }
  0x5a   : > { %811 = vmatprep.subr.bf16.mxu0 %v810_v6  ;;  %v320_v16 = vld [vmem:[#allocation6 + $0x90] sm:$0xff]  ;;  %v838_v17 = vpack.c.bf16 %v319_v15, %v318_v14  ;;  %v321_v18 = vld [vmem:[#allocation6 + $0x98] sm:$0xff]  ;;  %v322_v20 = vld [vmem:[#allocation6 + $0xa0] sm:$0xff]  ;;  %s1026_s7 = sshll.u32 %s1099_s16, 4  ;;  %s1027_s7 = int_to_ptr.vmem [resolvable:$false] %s1026_s7 }
  0x5b   : > { %v842_v19 = vpack.c.bf16 %v321_v18, %v320_v16  ;;  %v323_v21 = vld [vmem:[#allocation6 + $0xa8] sm:$0xff]  ;;  %v223_v23 = vld [vmem:[#allocation6 + $0x40] sm:$0xff]  ;;  %v324_v26 = vld [vmem:[#allocation6 + $0xb0] sm:$0xff]  ;;  %p1024_p6 = pnand %p1023_p4, %p1216_p12  ;;  %s1028_s10 = scalar_lea.vmem %s1027_s7, 512 }
  0x5c   : > { %839 = vmatprep.subr.bf16.mxu1 %v838_v17  ;;  %v224_v24 = vld [vmem:[#allocation6 + $0x48] sm:$0xff]  ;;  %v846_v25 = vpack.c.bf16 %v323_v21, %v322_v20  ;;  %v325_v27 = vld [vmem:[#allocation6 + $0xb8] sm:$0xff]  ;;  %v225_v30 = vld [vmem:[#allocation6 + $0x50] sm:$0xff]  ;;  %p1029_p10 = scmp.lt.s32.totalorder %s1293_s11, %s1027_s7  ;;  %p1030_p13 = scmp.lt.s32.totalorder %s1028_s10, %s1022_s22 }
  0x5d   : > { %813 = vmatpush3.bf16.msra.mxu0 %v810_v6  ;;  %841 = vmatpush3.bf16.msra.mxu1 %v838_v17  ;;  %v822_v28 = vpack.c.bf16 %v224_v24, %v223_v23  ;;  %v226_v31 = vld [vmem:[#allocation6 + $0x58] sm:$0xff]  ;;  %v850_v32 = vpack.c.bf16 %v325_v27, %v324_v26  ;;  %v326_v33 = vld [vmem:[#allocation6 + $0xc0] sm:$0xff]  ;;  %v327_v34 = vld [vmem:[#allocation6 + $0xc8] sm:$0xff]  ;;  %p1025_p8 = pneg %p1024_p6 }
  0x5e   : > { %815 = vmatprep.subr.bf16.mxu0 %v814_v10  ;;  %843 = vmatprep.subr.bf16.mxu1 %v842_v19  ;;  %v826_v35 = vpack.c.bf16 %v226_v31, %v225_v30  ;;  %v227_v36 = vld [vmem:[#allocation6 + $0x60] sm:$0xff]  ;;  %v228_v37 = vld [vmem:[#allocation6 + $0x68] sm:$0xff]  ;;  %v854_v38 = vpack.c.bf16 %v327_v34, %v326_v33  ;;  %v328_v39 = vld [vmem:[#allocation6 + $0xd0] sm:$0xff]  ;;  %p1031_p3 = por %p1030_p13, %p1029_p10 }
  0x5f   : > { %v329_v40 = vld [vmem:[#allocation6 + $0xd8] sm:$0xff]  ;;  %v830_v41 = vpack.c.bf16 %v228_v37, %v227_v36  ;;  %v229_v42 = vld [vmem:[#allocation6 + $0x70] sm:$0xff]  ;;  %v330_v47 = vld [vmem:[#allocation6 + $0xe0] sm:$0xff] }
  0x60   : > { %v213_v29 = vld [vmem:[#allocation2] sm:$0xff]  ;;  %v230_v43 = vld [vmem:[#allocation6 + $0x78] sm:$0xff]  ;;  %v858_v44 = vpack.c.bf16 %v329_v40, %v328_v39  ;;  %v331_v48 = vld [vmem:[#allocation6 + $0xe8] sm:$0xff]  ;;  %p1032_p7 = pnand %p1031_p3, %p1025_p8 }
  0x61   : > { %817 = vmatpush3.bf16.msra.mxu0 %v814_v10  ;;  %733 = vmatprep.mubr.f32.mxu0 %v213_v29  ;;  %v834_v45 = vpack.c.bf16 %v230_v43, %v229_v42  ;;  %v214_v46 = vld [vmem:[#allocation2 + $0x8] sm:$0xff]  ;;  %v862_v49 = vpack.c.bf16 %v331_v48, %v330_v47  ;;  %v332_v50 = vld [vmem:[#allocation6 + $0xf0] sm:$0xff]  ;;  %v422_v53 = vld [vmem:[#allocation6 + $0x100] sm:$0xff] }
  0x62   : > { %819 = vmatprep.subr.bf16.mxu0 %v818_v22  ;;  %845 = vmatpush3.bf16.msra.mxu1 %v842_v19  ;;  %v333_v51 = vld [vmem:[#allocation6 + $0xf8] sm:$0xff]  ;;  %v423_v54 = vld [vmem:[#allocation6 + $0x108] sm:$0xff]  ;;  %v424_v55 = vld [vmem:[#allocation6 + $0x110] sm:$0xff] }
  0x63   : > { %847 = vmatprep.subr.bf16.mxu1 %v846_v25  ;;  %v866_v52 = vpack.c.bf16 %v333_v51, %v332_v50  ;;  %v870_v56 = vpack.c.bf16 %v423_v54, %v422_v53  ;;  %v425_v57 = vld [vmem:[#allocation6 + $0x118] sm:$0xff]  ;;  %v426_v59 = vld [vmem:[#allocation6 + $0x120] sm:$0xff]  ;;  %v427_v60 = vld [vmem:[#allocation6 + $0x128] sm:$0xff] }
  0x64   : > { %v874_v58 = vpack.c.bf16 %v425_v57, %v424_v55  ;;  %v878_v61 = vpack.c.bf16 %v427_v60, %v426_v59  ;;  %v428_v62 = vld [vmem:[#allocation6 + $0x130] sm:$0xff]  ;;  %v429_v63 = vld [vmem:[#allocation6 + $0x138] sm:$0xff]  ;;  %v430_v1 = vld [vmem:[#allocation6 + $0x140] sm:$0xff] }
  0x65   : > { %821 = vmatpush3.bf16.msra.mxu0 %v818_v22  ;;  %v882_v0 = vpack.c.bf16 %v429_v63, %v428_v62  ;;  %v431_v2 = vld [vmem:[#allocation6 + $0x148] sm:$0xff]  ;;  %v432_v4 = vld [vmem:[#allocation6 + $0x150] sm:$0xff]  ;;  %v433_v5 = vld [vmem:[#allocation6 + $0x158] sm:$0xff] }
  0x66   : > { %823 = vmatprep.subr.bf16.mxu0 %v822_v28  ;;  %849 = vmatpush3.bf16.msra.mxu1 %v846_v25  ;;  %v886_v3 = vpack.c.bf16 %v431_v2, %v430_v1  ;;  %v890_v6 = vpack.c.bf16 %v433_v5, %v432_v4  ;;  %v635_v7 = vld [vmem:[%s1344_s2] ss:$0 sm:$0xff]  ;;  %v434_v16 = vld [vmem:[#allocation6 + $0x160] sm:$0xff]  ;;  %v435_v17 = vld [vmem:[#allocation6 + $0x168] sm:$0xff] }
  0x67   : > { %851 = vmatprep.subr.bf16.mxu1 %v850_v32  ;;  %v894_v18 = vpack.c.bf16 %v435_v17, %v434_v16  ;;  %v436_v19 = vld [vmem:[#allocation6 + $0x170] sm:$0xff]  ;;  %v437_v20 = vld [vmem:[#allocation6 + $0x178] sm:$0xff] }
  0x68   : > { %v898_v21 = vpack.c.bf16 %v437_v20, %v436_v19  ;;  %v637_v22 = vld [vmem:[%s1344_s2 + $0x1] ss:$0 sm:$0xff]  ;;  %v639_v31 = vld [vmem:[%s1344_s2 + $0x2] ss:$0 sm:$0xff] }
  0x69   : > { %825 = vmatpush3.bf16.msra.mxu0 %v822_v28 }
  0x6a   : > { %827 = vmatprep.subr.bf16.mxu0 %v826_v35  ;;  %853 = vmatpush3.bf16.msra.mxu1 %v850_v32 }
  0x6b   : > { %855 = vmatprep.subr.bf16.mxu1 %v854_v38 }
  0x6d   : > { %829 = vmatpush3.bf16.msra.mxu0 %v826_v35 }
  0x6e   : > { %831 = vmatprep.subr.bf16.mxu0 %v830_v41  ;;  %857 = vmatpush3.bf16.msra.mxu1 %v854_v38 }
  0x6f   : > { %859 = vmatprep.subr.bf16.mxu1 %v858_v44 }
  0x71   : > { %833 = vmatpush3.bf16.msra.mxu0 %v830_v41 }
  0x72   : > { %835 = vmatprep.subr.bf16.mxu0 %v834_v45  ;;  %861 = vmatpush3.bf16.msra.mxu1 %v858_v44 }
  0x73   : > { %863 = vmatprep.subr.bf16.mxu1 %v862_v49 }
  0x75   : > { %837 = vmatpush3.bf16.msra.mxu0 %v834_v45 }
  0x76   : > { %865 = vmatpush3.bf16.msra.mxu1 %v862_v49  ;;  %871 = vmatprep.subr.bf16.mxu0 %v870_v56 }
  0x77   : > { %867 = vmatprep.subr.bf16.mxu1 %v866_v52 }
  0x78   : > { %734 = vmatmul.mubr.f32.vlgmr.msra.gmra.mrb[0].mxu0 %v214_v46 }
  0x79   : > { %873 = vmatpush3.bf16.msra.mxu0 %v870_v56 }
  0x7a   : > { %869 = vmatpush3.bf16.msra.mxu1 %v866_v52  ;;  %875 = vmatprep.subr.bf16.mxu0 %v874_v58 }
  0x7d   : > { %877 = vmatpush3.bf16.msra.mxu0 %v874_v58 }
  0x7e   : > { %879 = vmatprep.subr.bf16.mxu0 %v878_v61 }
  0x81   : > { %881 = vmatpush3.bf16.msra.mxu0 %v878_v61 }
  0x82   : > { %883 = vmatprep.subr.bf16.mxu0 %v882_v0 }
  0x85   : > { %885 = vmatpush3.bf16.msra.mxu0 %v882_v0 }
  0x86   : > { %887 = vmatprep.subr.bf16.mxu0 %v886_v3 }
  0x89   : > { %889 = vmatpush3.bf16.msra.mxu0 %v886_v3 }
  0x8a   : > { %891 = vmatprep.subr.bf16.mxu0 %v890_v6 }
  0x8d   : > { %893 = vmatpush3.bf16.msra.mxu0 %v890_v6 }
  0x8e   : > { %895 = vmatprep.subr.bf16.mxu0 %v894_v18 }
  0x91   : > { %897 = vmatpush3.bf16.msra.mxu0 %v894_v18 }
  0x92   : > { %899 = vmatprep.subr.bf16.mxu0 %v898_v21 }
  0x95   : > { %901 = vmatpush3.bf16.msra.mxu0 %v898_v21 }
 0x14b   : > { %v735_v8 = vpop.f32.mrb[0].mxu0 }
 0x14c   : > { %v310_v9 = vadd.f32 %v735_v8, %v635_v7  ;;  %v304_v10 = vpop.f32.mrb[1].mxu0 }
 0x14d   : > { %v305_v11 = vadd.f32 %v635_v7, %v304_v10 }
 0x14e   : > { %v314_v12 = vmul.f32 0.01, %v310_v9 }
 0x14f   : > { %v313_v13 = vmul.f32 0.01, %v305_v11 }
 0x150   : > { %v316_v15 = vmax.f32 %v310_v9, %v314_v12 }
 0x151   : > { %v315_v14 = vmax.f32 %v305_v11, %v313_v13 }
 0x153   : > { %768 = vmatprep.mubr.f32.mxu1 %v315_v14 }
 0x154   : > { %769 = vmatmul.mubr.f32.vlgmr.msra.gmra.mrb[0].mxu1 %v316_v15 }
 0x227   : > { %v770_v23 = vpop.f32.mrb[0].mxu1 }
 0x228   : > { %v414_v24 = vadd.f32 %v770_v23, %v637_v22  ;;  %v408_v25 = vpop.f32.mrb[1].mxu1 }
 0x229   : > { %v409_v26 = vadd.f32 %v637_v22, %v408_v25 }
 0x22a   : > { %v418_v27 = vmul.f32 0.01, %v414_v24 }
 0x22b   : > { %v417_v28 = vmul.f32 0.01, %v409_v26 }
 0x22c   : > { %v420_v30 = vmax.f32 %v414_v24, %v418_v27 }
 0x22d   : > { %v419_v29 = vmax.f32 %v409_v26, %v417_v28 }
 0x22f   : > { %803 = vmatprep.mubr.f32.mxu0 %v419_v29 }
 0x230   : > { %804 = vmatmul.mubr.f32.vlgmr.msra.gmra.mrb[2].mxu0 %v420_v30 }
 0x303   : > { %v805_v32 = vpop.f32.mrb[2].mxu0 }
 0x304   : > { %v518_v33 = vadd.f32 %v805_v32, %v639_v31  ;;  %v512_v34 = vpop.f32.mrb[3].mxu0 }
 0x305   : > { %v513_v35 = vadd.f32 %v639_v31, %v512_v34 }
 0x306   : > { %v522_v36 = vmul.f32 0.01, %v518_v33 }
 0x307   : > { %v521_v37 = vmul.f32 0.01, %v513_v35 }
 0x308   : > { %v524_v38 = vmax.f32 %v518_v33, %v522_v36 }
 0x309   : > { %v523_v39 = vmax.f32 %v513_v35, %v521_v37 }
 0x30a   : > { %526 = vst [vmem:[%s203_s5 + $0x8] sm:$0xff] %v524_v38 }
 0x30b   : > { %525 = vst [vmem:[%s203_s5] sm:$0xff] %v523_v39 }
 0x30c   : > { %1035 = shalt.err (!%p1032_p7)
}
 0x30d   : > { %s1036_s26 = scalar_lea.hbm %s1298_s29, 256  ;;  %s1040_s8 = scalar_lea.hbm %s1345_s3, 512 }
 0x30e   : > { %p1037_p9 = scmp.ne.s32.totalorder %s1298_s29, %s1036_s26  ;;  %p1041_p5 = scmp.lt.u32.totalorder %s1298_s29, %s1345_s3 }
 0x30f   : > { %p1042_p11 = scmp.lt.u32.totalorder %s1040_s8, %s1036_s26  ;;  %p1044_p4 = scmp.lt.u32.totalorder %s1036_s26, %s1298_s29 }
 0x310   : > { %p1038_p1 = pnand %p1037_p9, %p1216_p12 }
 0x311   : > { %p1043_p2 = por %p1042_p11, %p1041_p5 }
 0x312   : > { %p1039_p0 = pneg %p1038_p1 }
 0x313   : > { %p1045_p6 = por %p1044_p4, %p1043_p2 }
 0x315   : > { %p1046_p8 = pnand %p1045_p6, %p1039_p0 }
 0x317   : > { %1049 = shalt.err (!%p1046_p8)
}
 0x318   : > { %s1100_s25 = smov 128   ;;  %s1101_s5 = smov 8  }
 0x319   : > { %908 = dma.vmem_to_hbm [thread:$0]  (%p1216_p12), %s1293_s11, 256, %s1298_s29, %s528_s30, %s1100_s25, %s1100_s25, %s1101_s5  }
 0x31a PF: > { %s556_s27 = sand.u32 1, %s1080_s12   ;;  %p1360_p10 = scmp.ne.s32.totalorder %s1350_s19, 0 }
 0x31b   : > { %p1361_p13 = scmp.ge.s32.totalorder %s1092_s15, 2  ;;  %s557_s28 = scalar_lea.sflag [#allocation5], %s556_s27 }
 0x31d   : > { %p919_p3 = pnand %p1361_p13, %p1360_p10 }
 0x31f   : > { %1075 = dma.done.wait (!%p919_p3), %s557_s28, 256  }
 0x320   : > { %1077 = vsyncadd (!%p919_p3), %s557_s28, 4294967040  ;;  %p17_p7 = scmp.ge.s32.totalorder %s1178_s24, 4   ;;  %s1362_s12 = smov %s1084_s13 }
 0x321   : > { %s1363_s13 = smov %s1088_s14  ;;  %s1364_s14 = smov %s1212_s17 }
 0x322   : > { %s1365_s15 = smov %s1178_s24  ;;  %19 = sbr.rel (!%p17_p7) target bundleno = 6 (0x6), region = 85 }
 0x329   :  { %562 = vsyncpa [#allocation4], 1 }
 0x32a   :  { %564 = vsyncpa [#allocation4 + $0x1], 1 }
 0x32b   :  { %565 = vsyncpa [#allocation7], 1 }
 0x32c   :  { %566 = vsyncpa [#allocation5], 1 }
 0x32d   :  { %568 = vsyncpa [#allocation5 + $0x1], 1 }

</bundles_post_ra>
